<compile_context>
chip_gen: v5e
topology: v5e:2x2
jax: 0.10.0
libtpu: 0.0.40
codegen_flags: <defaults>
</compile_context>

<pallas_src>
import jax
import jax.numpy as jnp
from jax.experimental import pallas as pl
from jax.experimental.pallas import tpu as pltpu


def _sigmoid_1eup(z):
    # sigmoid(z) == 0.5 * tanh(z/2) + 0.5  -> one EUP op instead of exp + reciprocal.
    return 0.5 * jnp.tanh(0.5 * z) + 0.5


def _mlp_kernel(x_ref, w1_ref, b1_ref, w2_ref, b2_ref, w3t_ref, b3_ref, o_ref):
    # x_ref: (1, TB) block — batch on the lane axis. All math in f32.
    x = x_ref[...].astype(jnp.float32)                                   # (1, TB)

    # Layer 1: Linear(1 -> 10). K == 1, so a VPU broadcast FMA (outer product),
    # not an MXU matmul whose K would be padded to 128/256.
    z1 = w1_ref[...] * x + b1_ref[...]                                   # (10,1)*(1,TB)+(10,1) -> (10,TB)
    h1 = _sigmoid_1eup(z1)

    # Layer 2: Linear(10 -> 20) on the MXU; the large batch dim is the MXU N dim.
    z2 = jnp.dot(w2_ref[...], h1, preferred_element_type=jnp.float32) + b2_ref[...]  # (20, TB)
    h2 = _sigmoid_1eup(z2)

    # Layer 3: Linear(20 -> 1). Only one useful MXU output row -> keep it off the MXU:
    # per-lane weighted sum over the 20 feature sublanes (VPU multiply + XLU reduce).
    out = jnp.sum(w3t_ref[...] * h2, axis=0, keepdims=True) + b3_ref[...]             # (1, TB)

    o_ref[...] = out.astype(o_ref.dtype)                                 # lane-dense (1, TB) store


def _pick_tile(n, requested=None):
    """Batch (lane) tile: as large as the default scoped VMEM allows on v5e/v6e/v7x, multiple of
    256, shrunk only enough to keep >=4 grid steps for pipelining / v7x dual-TC sharding."""
    cap = 65536  # ~150*tb bytes of live f32 activations + I/O double buffers ≈ 10-12 MB -> fits everywhere
    tb = cap if requested is None else int(requested)
    tb = max(256, min((tb // 256) * 256, cap))
    while tb > 256 and pl.cdiv(n, tb) < 4:
        tb = max(256, ((tb // 2) // 256) * 256)
    return tb


def order2_ode_forward(x, params, *, tb=None):
    """x: (N, 1). params: PyTorch-layout weights w1(10,1) b1(10,1) w2(20,10) b2(20,1) w3(1,20) b3(1,1).
    Output dtype follows x.dtype (pass bf16 x to halve HBM traffic); internal math is f32."""
    N, one = x.shape
    assert one == 1
    w1, b1 = params["w1"], params["b1"]
    w2, b2 = params["w2"], params["b2"]
    w3, b3 = params["w3"], params["b3"]
    w3t = w3.T  # (20, 1) column so the kernel can do a per-lane weighted sublane sum directly.

    tb = _pick_tile(N, tb)
    grid = (pl.cdiv(N, tb),)

    # Batch on the lane axis; (N,1) -> (1,N) is a free reshape, no padding pass over HBM.
    xt = x.reshape(1, N)

    def whole(arr):
        # Whole-array block with a constant block index -> stays resident in VMEM across the grid.
        return pl.BlockSpec(arr.shape, lambda i: (0, 0))

    out_t = pl.pallas_call(
        _mlp_kernel,
        out_shape=jax.ShapeDtypeStruct((1, N), x.dtype),
        grid_spec=pltpu.PrefetchScalarGridSpec(
            num_scalar_prefetch=0,
            grid=grid,
            in_specs=[
                pl.BlockSpec((1, tb), lambda i: (0, i)),  # x tile (lane-dense; last block may be ragged)
                whole(w1), whole(b1),
                whole(w2), whole(b2),
                whole(w3t), whole(b3),
            ],
            out_specs=pl.BlockSpec((1, tb), lambda i: (0, i)),
        ),
        compiler_params=pltpu.CompilerParams(
            dimension_semantics=("parallel",),
            vmem_limit_bytes=32 * 1024 * 1024,
        ),
    )(xt, w1, b1, w2, b2, w3t, b3)

    return out_t.reshape(N, 1)


def init_params(key):
    """Deterministic init mirroring nn.Linear's U(-1/sqrt(fan_in), 1/sqrt(fan_in)), PyTorch (out, in) layout."""
    def linear_init(k, fan_in, fan_out):
        kw, kb = jax.random.split(k)
        bound = 1.0 / jnp.sqrt(fan_in)
        w = jax.random.uniform(kw, (fan_out, fan_in), jnp.float32, -bound, bound)  # (out, in)
        b = jax.random.uniform(kb, (fan_out, 1), jnp.float32, -bound, bound)       # column bias
        return w, b

    k1, k2, k3 = jax.random.split(key, 3)
    w1, b1 = linear_init(k1, 1, 10)
    w2, b2 = linear_init(k2, 10, 20)
    w3, b3 = linear_init(k3, 20, 1)
    return dict(w1=w1, b1=b1, w2=w2, b2=b2, w3=w3, b3=b3)


def reference_forward(x, p):
    # Same math as the PyTorch module, in plain XLA (batch-major).
    h1 = jax.nn.sigmoid(x * p["w1"].T + p["b1"].T)   # (N, 10)
    h2 = jax.nn.sigmoid(h1 @ p["w2"].T + p["b2"].T)  # (N, 20)
    return h2 @ p["w3"].T + p["b3"].T                # (N, 1)


if __name__ == "__main__":
    key = jax.random.PRNGKey(0)
    kp, kx = jax.random.split(key)
    params = init_params(kp)

    # Small batch of scalar ODE sample points; not a multiple of the lane tile, so this exercises
    # the ragged final block and a multi-step grid (tile picker gives tb=256 -> 4 grid steps).
    N = 1000
    x = jax.random.uniform(kx, (N, 1), jnp.float32, -1.0, 1.0)

    out = jax.block_until_ready(order2_ode_forward(x, params))

    ref = reference_forward(x, params)
    assert out.shape == (N, 1)
    assert jnp.allclose(out, ref, atol=1e-4, rtol=1e-4), "mismatch vs reference"

    print("KERNEL_OK")
</pallas_src>

<mosaic_0001>
module attributes {stable_mosaic.version = 11 : i64} {
  func.func @_mlp_kernel(%arg0: i32, %arg1: memref<1x256xf32, #tpu.memory_space<vmem>>, %arg2: memref<10x1xf32, #tpu.memory_space<vmem>>, %arg3: memref<10x1xf32, #tpu.memory_space<vmem>>, %arg4: memref<20x10xf32, #tpu.memory_space<vmem>>, %arg5: memref<20x1xf32, #tpu.memory_space<vmem>>, %arg6: memref<20x1xf32, #tpu.memory_space<vmem>>, %arg7: memref<1x1xf32, #tpu.memory_space<vmem>>, %arg8: memref<1x256xf32, #tpu.memory_space<vmem>>) attributes {dimension_semantics = [#tpu.dimension_semantics<parallel>], iteration_bounds = array<i64: 4>, scalar_prefetch = 0 : i64, scratch_operands = 0 : i64, tpu.core_type = #tpu.core_type<tc>, window_params = [{transform_indices = @transform_0, window_bounds = array<i64: 1, 256>}, {pipeline_mode = #tpu.pipeline_mode<synchronous>, transform_indices = @transform_1, window_bounds = array<i64: 10, 1>}, {pipeline_mode = #tpu.pipeline_mode<synchronous>, transform_indices = @transform_2, window_bounds = array<i64: 10, 1>}, {pipeline_mode = #tpu.pipeline_mode<synchronous>, transform_indices = @transform_3, window_bounds = array<i64: 20, 10>}, {pipeline_mode = #tpu.pipeline_mode<synchronous>, transform_indices = @transform_4, window_bounds = array<i64: 20, 1>}, {pipeline_mode = #tpu.pipeline_mode<synchronous>, transform_indices = @transform_5, window_bounds = array<i64: 20, 1>}, {pipeline_mode = #tpu.pipeline_mode<synchronous>, transform_indices = @transform_6, window_bounds = array<i64: 1, 1>}, {transform_indices = @transform_7, window_bounds = array<i64: 1, 256>}]} {
    %c0 = arith.constant 0 : index
    %c0_0 = arith.constant 0 : index
    %0 = vector.load %arg1[%c0, %c0_0] : memref<1x256xf32, #tpu.memory_space<vmem>>, vector<1x256xf32>
    %c0_1 = arith.constant 0 : index
    %c0_2 = arith.constant 0 : index
    %1 = vector.load %arg2[%c0_1, %c0_2] : memref<10x1xf32, #tpu.memory_space<vmem>>, vector<10x1xf32>
    %2 = vector.broadcast %1 : vector<10x1xf32> to vector<10x256xf32>
    %3 = vector.broadcast %0 : vector<1x256xf32> to vector<10x256xf32>
    %4 = arith.mulf %2, %3 : vector<10x256xf32>
    %c0_3 = arith.constant 0 : index
    %c0_4 = arith.constant 0 : index
    %5 = vector.load %arg3[%c0_3, %c0_4] : memref<10x1xf32, #tpu.memory_space<vmem>>, vector<10x1xf32>
    %6 = vector.broadcast %5 : vector<10x1xf32> to vector<10x256xf32>
    %7 = arith.addf %4, %6 : vector<10x256xf32>
    %cst = arith.constant 5.000000e-01 : f32
    %8 = vector.broadcast %cst : f32 to vector<10x256xf32>
    %9 = arith.mulf %8, %7 : vector<10x256xf32>
    %10 = math.tanh %9 : vector<10x256xf32>
    %cst_5 = arith.constant 5.000000e-01 : f32
    %11 = vector.broadcast %cst_5 : f32 to vector<10x256xf32>
    %12 = arith.mulf %11, %10 : vector<10x256xf32>
    %cst_6 = arith.constant 5.000000e-01 : f32
    %13 = vector.broadcast %cst_6 : f32 to vector<10x256xf32>
    %14 = arith.addf %12, %13 : vector<10x256xf32>
    %c0_7 = arith.constant 0 : index
    %c0_8 = arith.constant 0 : index
    %15 = vector.load %arg4[%c0_7, %c0_8] : memref<20x10xf32, #tpu.memory_space<vmem>>, vector<20x10xf32>
    %cst_9 = arith.constant dense<0.000000e+00> : vector<20x256xf32>
    %16 = tpu.matmul %15, %14, %cst_9 {dimension_numbers = #tpu.dot_dimension_numbers<[1], [0], [0], [1], [0, 0, 1, 1], [], []>} : vector<20x10xf32>, vector<10x256xf32>, vector<20x256xf32> -> vector<20x256xf32>
    %c0_10 = arith.constant 0 : index
    %c0_11 = arith.constant 0 : index
    %17 = vector.load %arg5[%c0_10, %c0_11] : memref<20x1xf32, #tpu.memory_space<vmem>>, vector<20x1xf32>
    %18 = vector.broadcast %17 : vector<20x1xf32> to vector<20x256xf32>
    %19 = arith.addf %16, %18 : vector<20x256xf32>
    %cst_12 = arith.constant 5.000000e-01 : f32
    %20 = vector.broadcast %cst_12 : f32 to vector<20x256xf32>
    %21 = arith.mulf %20, %19 : vector<20x256xf32>
    %22 = math.tanh %21 : vector<20x256xf32>
    %cst_13 = arith.constant 5.000000e-01 : f32
    %23 = vector.broadcast %cst_13 : f32 to vector<20x256xf32>
    %24 = arith.mulf %23, %22 : vector<20x256xf32>
    %cst_14 = arith.constant 5.000000e-01 : f32
    %25 = vector.broadcast %cst_14 : f32 to vector<20x256xf32>
    %26 = arith.addf %24, %25 : vector<20x256xf32>
    %c0_15 = arith.constant 0 : index
    %c0_16 = arith.constant 0 : index
    %27 = vector.load %arg6[%c0_15, %c0_16] : memref<20x1xf32, #tpu.memory_space<vmem>>, vector<20x1xf32>
    %28 = vector.broadcast %27 : vector<20x1xf32> to vector<20x256xf32>
    %29 = arith.mulf %28, %26 : vector<20x256xf32>
    %cst_17 = arith.constant dense<0.000000e+00> : vector<256xf32>
    %30 = vector.multi_reduction <add>, %29, %cst_17 [0] : vector<20x256xf32> to vector<256xf32>
    %31 = vector.shape_cast %30 : vector<256xf32> to vector<1x256xf32>
    %c0_18 = arith.constant 0 : index
    %c0_19 = arith.constant 0 : index
    %32 = vector.load %arg7[%c0_18, %c0_19] : memref<1x1xf32, #tpu.memory_space<vmem>>, vector<1x1xf32>
    %33 = vector.broadcast %32 : vector<1x1xf32> to vector<1x256xf32>
    %34 = arith.addf %31, %33 : vector<1x256xf32>
    %c0_20 = arith.constant 0 : index
    %c0_21 = arith.constant 0 : index
    %35 = vector.load %arg8[%c0_20, %c0_21] : memref<1x256xf32, #tpu.memory_space<vmem>>, vector<1x256xf32>
    tpu.vector_store %arg8[%c0_20, %c0_21], %34 {strides = array<i32>} : memref<1x256xf32, #tpu.memory_space<vmem>>, vector<1x256xf32>,
    return
  }
  func.func @transform_0(%arg0: i32) -> (i32, i32) {
    %c0_i32 = arith.constant 0 : i32
    %c0_i32_0 = arith.constant 0 : i32
    return %c0_i32, %arg0 : i32, i32
  }
  func.func @transform_1(%arg0: i32) -> (i32, i32) {
    %c0_i32 = arith.constant 0 : i32
    %c0_i32_0 = arith.constant 0 : i32
    %c0_i32_1 = arith.constant 0 : i32
    return %c0_i32, %c0_i32_0 : i32, i32
  }
  func.func @transform_2(%arg0: i32) -> (i32, i32) {
    %c0_i32 = arith.constant 0 : i32
    %c0_i32_0 = arith.constant 0 : i32
    %c0_i32_1 = arith.constant 0 : i32
    return %c0_i32, %c0_i32_0 : i32, i32
  }
  func.func @transform_3(%arg0: i32) -> (i32, i32) {
    %c0_i32 = arith.constant 0 : i32
    %c0_i32_0 = arith.constant 0 : i32
    %c0_i32_1 = arith.constant 0 : i32
    return %c0_i32, %c0_i32_0 : i32, i32
  }
  func.func @transform_4(%arg0: i32) -> (i32, i32) {
    %c0_i32 = arith.constant 0 : i32
    %c0_i32_0 = arith.constant 0 : i32
    %c0_i32_1 = arith.constant 0 : i32
    return %c0_i32, %c0_i32_0 : i32, i32
  }
  func.func @transform_5(%arg0: i32) -> (i32, i32) {
    %c0_i32 = arith.constant 0 : i32
    %c0_i32_0 = arith.constant 0 : i32
    %c0_i32_1 = arith.constant 0 : i32
    return %c0_i32, %c0_i32_0 : i32, i32
  }
  func.func @transform_6(%arg0: i32) -> (i32, i32) {
    %c0_i32 = arith.constant 0 : i32
    %c0_i32_0 = arith.constant 0 : i32
    %c0_i32_1 = arith.constant 0 : i32
    return %c0_i32, %c0_i32_0 : i32, i32
  }
  func.func @transform_7(%arg0: i32) -> (i32, i32) {
    %c0_i32 = arith.constant 0 : i32
    %c0_i32_0 = arith.constant 0 : i32
    return %c0_i32, %arg0 : i32, i32
  }
}

</mosaic_0001>

<bundles_post_ra>
// kernel: tpu_custom_call.1
= control target key start
LH: loop header
LB: loop body
LE: loop exit
PB: predicated region body
PF: predicated region fallthrough
CT: control target
= control target key end

     0   :  { %s902_s0 = inlined_call_operand.vmem [shape: f32[1,1000], index: 0, kind: input, shape index: {}]   ;;  %s903_s1 = inlined_call_operand.vmem [shape: f32[10,1], index: 1, kind: input, shape index: {}]   ;;  %s904_s2 = inlined_call_operand.vmem [shape: f32[10,1], index: 2, kind: input, shape index: {}]   ;;  %s905_s3 = inlined_call_operand.vmem [shape: f32[20,10], index: 3, kind: input, shape index: {}]   ;;  %s906_s4 = inlined_call_operand.vmem [shape: f32[20,1], index: 4, kind: input, shape index: {}]   ;;  %s907_s5 = inlined_call_operand.vmem [shape: f32[20,1], index: 5, kind: input, shape index: {}]   ;;  %s908_s6 = inlined_call_operand.<no memory space> [shape: f32[1,1], index: 6, kind: input, shape index: {}]   ;;  %s909_s7 = inlined_call_operand.hbm [shape: f32[1,1000], index: 7, kind: output, shape index: {}]  }
   0x1   :  { %v12_v0 = vstv %s908_s6 }
   0x2   :  { %13 = vst [vmem:[#allocation2] sm:$0x1] %v12_v0 }
   0x3   :  { %14 = vsyncpa [#allocation4], 0 }
   0x4   :  { %16 = vsyncpa [#allocation4 + $0x1], 0  ;;  %s775_s26 = smov 0   ;;  %s777_s27 = smov 0  }
   0x5   :  { %s779_s28 = smov 0   ;;  %s781_s29 = smov 0  }
   0x6 LB: > { %s581_s6 = sadd.s32 4294967295, %s729_s29   ;;  %s582_s30 = sadd.s32 4294967294, %s729_s29   ;;  %s729_s29 = sphi %s781_s29, %s915_s29   ;;  %s725_s28 = sphi %s779_s28, %s914_s28   ;;  %s721_s27 = sphi %s777_s27, %s913_s27   ;;  %s717_s26 = sphi %s775_s26, %s912_s26  }
   0x7   : > { %s798_s8 = sadd.s32 1, %s729_s29   ;;  %s181_s9 = sadd.s32 1, %s725_s28 }
   0x8   : > { %s178_s10 = ssub.s32 %s729_s29, %s798_s8  ;;  %p191_p0 = scmp.ne.s32.totalorder %s725_s28, %s721_s27 }
   0x9   : > { %p179_p1 = scmp.eq.s32.totalorder %s178_s10, 0  ;;  %p192_p2 = scmp.eq.s32.totalorder %s581_s6, 3 }
   0xa   : > { %p197_p3 = scmp.ne.s32.totalorder %s721_s27, %s717_s26  ;;  %p198_p4 = scmp.eq.s32.totalorder %s582_s30, 3 }
   0xb   : > { %s810_s11 = scalar_select %p179_p1, %s725_s28, %s181_s9  }
   0xc   : > { %p812_p5 = por %p192_p2, %p191_p0  ;;  %p816_p6 = por %p198_p4, %p197_p3 }
   0xd   : > { %p585_p7 = scmp.ge.s32.totalorder %s729_s29, 1  ;;  %p242_p8 = scmp.lt.s32.totalorder %s729_s29, 5 }
   0xf   : > { %p243_p9 = pnand %p585_p7, %p242_p8 }
  0x10   : > { %s845_s10 = sshll.u32 (!%p243_p9), %s581_s6, 1  ;;  %s270_s15 = sand.u32 (!%p243_p9), 1, %s721_s27  }
  0x11   : > { %246 = sbr.rel (%p243_p9) target bundleno = 347 (0x15b), region = 48  ;;  %p274_p10 = scmp.lt.s32.totalorder (!%p243_p9), %s845_s10, 7 }
  0x12   : > { %s586_s16 = sshll.u32 (!%p243_p9), %s270_s15, 1  ;;  %s521_s18 = scalar_lea.hbm (!%p243_p9), %s909_s7, %s845_s10 }
  0x13   : > { %s272_s19 = scalar_lea.vmem (!%p243_p9), [#allocation3], %s586_s16  ;;  %s525_s21 = sshll.u32 (!%p243_p9), %s521_s18, 4  ;;  %s526_s21 = int_to_ptr.hbm [resolvable:$true] %s525_s21 }
  0x14   : > { %s523_s20 = sshll.u32 (!%p243_p9), %s272_s19, 4  ;;  %s511_s22 = scalar_lea.sflag (!%p243_p9), [#allocation4], %s270_s15  ;;  %s524_s20 = int_to_ptr.vmem [resolvable:$true] %s523_s20 }
  0x15   : > { %s681_s23 = sshra.s32 (!%p243_p9), %s526_s21, 4  ;;  %s687_s30 = scalar_lea.hbm (!%p243_p9), %s909_s7, 8  ;;  %s682_s23 = int_to_ptr.hbm [resolvable:$true] %s681_s23 }
  0x16   : > { %v302_v1 = vld [vmem:[%s904_s2 + $0x8] sm:$0x3]  ;;  %v731_v3 = vmov 0   ;;  %v301_v4 = vld [vmem:[%s904_s2] sm:$0xff]  ;;  %v338_v7 = vld [vmem:[%s906_s4 + $0x10] sm:$0xf]  ;;  %p688_p0 = scmp.lt.s32.totalorder %s682_s23, %s909_s7 }
  0x17   : > { %v281_v2 = vld [vmem:[%s903_s1 + $0x8] sm:$0x3]  ;;  %645 = vset.pattern.permute.xlu1 %v731_v3  ;;  %644 = vset.pattern.permute.xlu0 %v731_v3  ;;  %v280_v5 = vld [vmem:[%s903_s1] sm:$0xff]  ;;  %v449_v9 = vld [vmem:[%s907_s5 + $0x10] sm:$0xf]  ;;  %s275_s14 = scalar_select %p274_p10, %s845_s10, 7 }
  0x18   : > { %310 = vperm.xlu1 %645, %v302_v1   ;;  %289 = vperm.xlu0 %644, %v281_v2   ;;  %v447_v6 = vld [vmem:[%s907_s5] sm:$0xff]  ;;  %v337_v28 = vld [vmem:[%s906_s4 + $0x8] sm:$0xff]  ;;  %vm364_vm0 = vcmask 1041408   ;;  %vm354_vm1 = vcmask 80896   ;;  %v335_v46 = vld [vmem:[%s905_s3 + $0x10] sm:$0xf] }
  0x19   : > { %646 = vset.pattern.permute.xlu2 %v731_v3  ;;  %v490_v8 = vld [vmem:[#allocation2] sm:$0x1]  ;;  %s276_s17 = scalar_lea.vmem %s902_s0, %s275_s14  ;;  %v448_v37 = vld [vmem:[%s907_s5 + $0x8] sm:$0xff]  ;;  %vm472_vm2 = vcmask 1043456   ;;  %vm502_vm3 = vcmask 1040384   ;;  %s683_s10 = scalar_lea.hbm %s682_s23, 2 }
  0x1a   : > { %v279_v10 = vld [vmem:[%s276_s17] sm:$0x3]  ;;  %v334_v45 = vld [vmem:[%s905_s3 + $0x8] sm:$0xff]  ;;  %p684_p11 = scmp.ne.s32.totalorder %s682_s23, %s683_s10  ;;  %p689_p1 = scmp.lt.s32.totalorder %s687_s30, %s683_s10 }
  0x1b   : > { %v293_v11 = vperm.slane %v279_v10, 0  ;;  %v294_v12 = vperm.slane %v279_v10, 1  ;;  %v336_v21 = vld [vmem:[%s906_s4] sm:$0xff] }
  0x1c   : > { %341 = vperm.xlu2 %646, %v336_v21   ;;  %v333_v44 = vld [vmem:[%s905_s3] sm:$0xff]  ;;  %p685_p12 = pnand %p684_p11, %p812_p5  ;;  %p690_p2 = por %p689_p1, %p688_p0 }
  0x1e   : > { %p686_p13 = pneg %p685_p12 }
  0x20   : > { %305 = vperm.xlu1 %645, %v301_v4   ;;  %284 = vperm.xlu0 %644, %v280_v5   ;;  %p691_p3 = pnand %p690_p2, %p686_p13 }
  0x24   : > { %346 = vperm.xlu2 %646, %v337_v28  }
  0x28   : > { %452 = vperm.xlu1 %645, %v447_v6   ;;  %351 = vperm.xlu0 %644, %v338_v7  }
  0x2c   : > { %457 = vperm.xlu2 %646, %v448_v37  }
  0x30   : > { %493 = vperm.xlu1 %645, %v490_v8   ;;  %462 = vperm.xlu0 %644, %v449_v9  }
  0x76   : > { %v342_v47 = vpop.permute.xlu2 %341 }
  0x7e   : > { %v347_v52 = vpop.permute.xlu2 %346 }
  0x8a   : > { %v311_v13 = vpop.permute.xlu1 %310  ;;  %v290_v14 = vpop.permute.xlu0 %289 }
  0x8b   : > { %v299_v15 = vmul.f32 %v293_v11, %v290_v14  ;;  %v300_v16 = vmul.f32 %v294_v12, %v290_v14 }
  0x8d   : > { %v315_v17 = vadd.f32 %v311_v13, %v299_v15  ;;  %v316_v18 = vadd.f32 %v311_v13, %v300_v16 }
  0x8f   : > { %v319_v19 = vmul.f32 0.5, %v315_v17  ;;  %v320_v20 = vmul.f32 0.5, %v316_v18  ;;  %v458_v18 = vpop.permute.xlu2 %457 }
  0x91   : > { %647 = vtanh.f32 %v319_v19 }
  0x92   : > { %v285_v22 = vpop.permute.xlu0 %284  ;;  %649 = vtanh.f32 %v320_v20  ;;  %v306_v25 = vpop.permute.xlu1 %305 }
  0x93   : > { %v297_v23 = vmul.f32 %v293_v11, %v285_v22  ;;  %v298_v24 = vmul.f32 %v294_v12, %v285_v22 }
  0x95   : > { %v313_v26 = vadd.f32 %v306_v25, %v297_v23  ;;  %v314_v27 = vadd.f32 %v306_v25, %v298_v24 }
  0x97   : > { %v648_v29 = vpop.eup %647  ;;  %v317_v30 = vmul.f32 0.5, %v313_v26  ;;  %v318_v31 = vmul.f32 0.5, %v314_v27 }
  0x98   : > { %v650_v32 = vpop.eup %649  ;;  %v327_v33 = vmul.f32 0.5, %v648_v29 }
  0x99   : > { %v328_v34 = vmul.f32 0.5, %v650_v32  ;;  %651 = vtanh.f32 %v317_v30 }
  0x9a   : > { %v331_v35 = vadd.f32 0.5, %v327_v33  ;;  %653 = vtanh.f32 %v318_v31  ;;  %v352_v61 = vpop.permute.xlu0 %351  ;;  %v453_v22 = vpop.permute.xlu1 %452 }
  0x9b   : > { %v332_v36 = vadd.f32 0.5, %v328_v34 }
  0x9c   : > { %588 = vmatpush.msk.msra.mxu0 %vm364_vm0, %v331_v35  ;;  %600 = vmatpush.msk.msra.mxu2 %vm364_vm0, %v331_v35 }
  0x9d   : > { %592 = vmatpush.msk.msra.mxu1 %vm364_vm0, %v332_v36  ;;  %602 = vmatpush.msk.msra.mxu3 %vm364_vm0, %v332_v36 }
  0x9f   : > { %v652_v38 = vpop.eup %651 }
  0xa0   : > { %v654_v39 = vpop.eup %653  ;;  %v325_v40 = vmul.f32 0.5, %v652_v38 }
  0xa1   : > { %v326_v41 = vmul.f32 0.5, %v654_v39 }
  0xa2   : > { %v329_v42 = vadd.f32 0.5, %v325_v40  ;;  %v463_v25 = vpop.permute.xlu0 %462 }
  0xa3   : > { %v330_v43 = vadd.f32 0.5, %v326_v41 }
  0xa4   : > { %386 = vmatpush.msra.mxu0 %v329_v42  ;;  %601 = vmatpush.msra.mxu2 %v329_v42 }
  0xa5   : > { %412 = vmatpush.msra.mxu1 %v330_v43  ;;  %603 = vmatpush.msra.mxu3 %v330_v43 }
  0xa6   : > { %589 = vmatmul.msk.f32.vlgmr.msra.gmra.mxu0 %vm354_vm1, %v333_v44  ;;  %590 = vmatmul.msk.f32.vlgmr.msra.gmra.mxu2 %vm354_vm1, %v334_v45 }
  0xa7   : > { %593 = vmatmul.msk.f32.vlgmr.msra.gmra.mxu1 %vm354_vm1, %v333_v44  ;;  %594 = vmatmul.msk.f32.vlgmr.msra.gmra.mxu3 %vm354_vm1, %v334_v45  ;;  %v494_v45 = vpop.permute.xlu1 %493 }
  0xae   : > { %591 = vmatmul.msk.f32.gmra.mxu2 %vm354_vm1, %v335_v46 }
  0xaf   : > { %595 = vmatmul.msk.f32.gmra.mxu3 %vm354_vm1, %v335_v46 }
 0x123   : > { %v388_v48 = vpop.f32.mrf.mxu0 }
 0x124   : > { %v389_v49 = vadd.f32 %v388_v48, %v342_v47  ;;  %v414_v50 = vpop.f32.mrf.mxu1  ;;  %v496_v48 = vperm.slane %v494_v45, 0 }
 0x125   : > { %v415_v51 = vadd.f32 %v414_v50, %v342_v47 }
 0x126   : > { %v423_v53 = vmul.f32 0.5, %v389_v49 }
 0x127   : > { %v424_v58 = vmul.f32 0.5, %v415_v51  ;;  %v505_v51 = vlaneseq }
 0x128   : > { %655 = vtanh.f32 %v423_v53 }
 0x129   : > { %v391_v54 = vpop.f32.mrf.mxu2  ;;  %vm507_vm4 = vcmp.lt.s32.totalorder %v505_v51, 256 }
 0x12a   : > { %v392_v55 = vadd.f32 %v391_v54, %v347_v52  ;;  %v417_v56 = vpop.f32.mrf.mxu3 }
 0x12b   : > { %v418_v57 = vadd.f32 %v417_v56, %v347_v52 }
 0x12c   : > { %v425_v59 = vmul.f32 0.5, %v392_v55 }
 0x12d   : > { %v426_v60 = vmul.f32 0.5, %v418_v57 }
 0x12e   : > { %657 = vtanh.f32 %v425_v59  ;;  %v656_v1 = vpop.eup %655 }
 0x12f   : > { %659 = vtanh.f32 %v426_v60  ;;  %v435_v10 = vmul.f32 0.5, %v656_v1 }
 0x130   : > { %661 = vtanh.f32 %v424_v58 }
 0x131   : > { %v394_v62 = vpop.f32.mrf.mxu2  ;;  %v441_v15 = vadd.f32 0.5, %v435_v10 }
 0x132   : > { %v395_v63 = vadd.f32 %v394_v62, %v352_v61  ;;  %v420_v0 = vpop.f32.mrf.mxu3 }
 0x133   : > { %v421_v2 = vadd.f32 %v420_v0, %v352_v61  ;;  %v465_v26 = vmul.f32 %v453_v22, %v441_v15 }
 0x134   : > { %v658_v3 = vpop.eup %657  ;;  %v427_v4 = vmul.f32 0.5, %v395_v63 }
 0x135   : > { %v660_v5 = vpop.eup %659  ;;  %v428_v6 = vmul.f32 0.5, %v421_v2  ;;  %v437_v8 = vmul.f32 0.5, %v658_v3 }
 0x136   : > { %v662_v7 = vpop.eup %661  ;;  %663 = vtanh.f32 %v427_v4  ;;  %v438_v9 = vmul.f32 0.5, %v660_v5 }
 0x137   : > { %665 = vtanh.f32 %v428_v6  ;;  %v436_v11 = vmul.f32 0.5, %v662_v7  ;;  %v443_v12 = vadd.f32 0.5, %v437_v8 }
 0x138   : > { %v444_v13 = vadd.f32 0.5, %v438_v9 }
 0x139   : > { %v442_v17 = vadd.f32 0.5, %v436_v11  ;;  %v467_v20 = vmul.f32 %v458_v18, %v443_v12 }
 0x13a   : > { %v468_v23 = vmul.f32 %v458_v18, %v444_v13 }
 0x13b   : > { %v466_v28 = vmul.f32 %v453_v22, %v442_v17  ;;  %v471_v30 = vadd.f32 %v467_v20, %v465_v26 }
 0x13c   : > { %v664_v14 = vpop.eup %663 }
 0x13d   : > { %v666_v16 = vpop.eup %665  ;;  %v439_v19 = vmul.f32 0.5, %v664_v14  ;;  %v481_v32 = vadd.f32 %v468_v23, %v466_v28 }
 0x13e   : > { %v440_v21 = vmul.f32 0.5, %v666_v16 }
 0x13f   : > { %v445_v24 = vadd.f32 0.5, %v439_v19 }
 0x140   : > { %v446_v27 = vadd.f32 0.5, %v440_v21 }
 0x141   : > { %v469_v29 = vmul.f32 %v463_v25, %v445_v24 }
 0x142   : > { %v470_v31 = vmul.f32 %v463_v25, %v446_v27 }
 0x143   : > { %v473_v33 = vsel %vm472_vm2, %v469_v29, 0.0 }
 0x144   : > { %v474_v34 = vadd.f32 %v473_v33, %v471_v30  ;;  %v482_v35 = vsel %vm472_vm2, %v470_v31, 0.0 }
 0x145   : > { %v483_v36 = vadd.f32 %v482_v35, %v481_v32 }
 0x146   : > { %v475_v37 = vrot.slane %v474_v34, 4 }
 0x147   : > { %v484_v38 = vrot.slane %v483_v36, 4 }
 0x148   : > { %v476_v39 = vadd.f32 %v475_v37, %v474_v34 }
 0x149   : > { %v485_v40 = vadd.f32 %v484_v38, %v483_v36 }
 0x14a   : > { %v477_v41 = vrot.slane %v476_v39, 2 }
 0x14b   : > { %v486_v42 = vrot.slane %v485_v40, 2 }
 0x14c   : > { %v478_v43 = vadd.f32 %v477_v41, %v476_v39 }
 0x14d   : > { %v487_v44 = vadd.f32 %v486_v42, %v485_v40 }
 0x14e   : > { %v479_v46 = vrot.slane %v478_v43, 1 }
 0x14f   : > { %v488_v47 = vrot.slane %v487_v44, 1 }
 0x150   : > { %v480_v49 = vadd.f32 %v479_v46, %v478_v43 }
 0x151   : > { %v489_v50 = vadd.f32 %v488_v47, %v487_v44 }
 0x152   : > { %v497_v53 = vadd.f32 %v496_v48, %v480_v49 }
 0x153   : > { %v498_v52 = vadd.f32 %v496_v48, %v489_v50 }
 0x155   : > { %v501_v54 = vrot.slane %v498_v52, 7 }
 0x157   : > { %v503_v55 = vsel %vm502_vm3, %v497_v53, %v501_v54 }
 0x158   : > { %509 = vst.msk [vmem:[%s272_s19] sm:$0x3] %vm507_vm4, %v503_v55 }
 0x159   : > { %694 = shalt.err (!%p691_p3)
}
 0x15a   : > { %604 = dma.vmem_to_hbm [thread:$0]  (%p812_p5), %s524_s20, 32, %s526_s21, %s511_s22  }
 0x15b PF: > { %p610_p4 = scmp.ge.s32.totalorder %s729_s29, 2  ;;  %s537_s15 = sand.u32 1, %s717_s26  }
 0x15c   : > { %s538_s16 = scalar_lea.sflag [#allocation4], %s537_s15 }
 0x15d   : > { %p607_p7 = pnand %p610_p4, %p816_p6 }
 0x15f   : > { %p608_p8 = pneg %p607_p7 }
 0x161   : > { %712 = dma.done.wait (%p608_p8), %s538_s16, 32  }
 0x162   : > { %714 = vsyncadd (%p608_p8), %s538_s16, 4294967264  ;;  %p19_p9 = scmp.ge.s32.totalorder %s798_s8, 6   ;;  %s912_s26 = smov %s721_s27 }
 0x163   : > { %s913_s27 = smov %s725_s28  ;;  %s914_s28 = smov %s810_s11 }
 0x164   : > { %s915_s29 = smov %s798_s8  ;;  %21 = sbr.rel (!%p19_p9) target bundleno = 6 (0x6), region = 83 }
 0x169   :  { %544 = vsyncpa [#allocation4], 1 }
 0x16a   :  { %546 = vsyncpa [#allocation4 + $0x1], 1 }

</bundles_post_ra>
